<compile_context>
chip_gen: v5e
topology: v5e:2x2
jax: 0.10.0
libtpu: 0.0.40
codegen_flags: <defaults>
</compile_context>

<pallas_src>
import jax
import jax.numpy as jnp
from jax.experimental import pallas as pl
from jax.experimental.pallas import tpu as pltpu


def _reduce_branch_kernel(x1_ref, x2_ref, w1_ref, w2_ref, o_ref):
    """One (image-batch, spatial-tile) grid step.

    x1_ref, x2_ref : (NB, C, ts)     channels on sublanes, spatial on lanes
    w1_ref, w2_ref : (C, C)          1x1-conv weights, (Cout, Cin), VMEM-resident
    o_ref          : (NB, 2, C, ts)  branch axis kept separate -> each result is one
                                     full aligned block store (no in-kernel concat).
    """
    w1 = w1_ref[...]
    w2 = w2_ref[...]
    nb = x1_ref.shape[0]
    for i in range(nb):  # static unroll, NB is capped small
        o_ref[i, 0] = jnp.dot(
            w1, x1_ref[i], preferred_element_type=jnp.float32
        ).astype(o_ref.dtype)
        o_ref[i, 1] = jnp.dot(
            w2, x2_ref[i], preferred_element_type=jnp.float32
        ).astype(o_ref.dtype)


def _vmem_capacity_bytes():
    try:
        return int(pltpu.get_tpu_info().vmem_capacity_bytes)
    except Exception:
        # Conservative fallback = smallest physical VMEM per core across v5e/v6e/v7x.
        return 64 * 1024 * 1024


def reduce_branch_pallas(x, w1, w2, stride=2):
    """x: (N, C, H, W) f32; w1, w2: (C, C) (Cout, Cin) 1x1-conv weights."""
    N, C, H, W = x.shape
    e = jnp.dtype(x.dtype).itemsize

    # --- indexing glue (single fused slice pass; see TODO above) -------------
    x1 = x[:, :, ::stride, ::stride]                            # (N, C, Ho, Wo)
    Ho, Wo = x1.shape[2], x1.shape[3]
    if stride == 2 and H % 2 == 0 and W % 2 == 0:
        # pad(x[:,:,1:,1:])[::2,::2] never samples the padded row/col for even H, W.
        x2 = x[:, :, 1::2, 1::2]                                # (N, C, Ho, Wo)
    else:
        shift = jnp.pad(x[:, :, 1:, 1:], ((0, 0), (0, 0), (0, 1), (0, 1)))
        x2 = shift[:, :, ::stride, ::stride]

    S = Ho * Wo
    x1f = x1.reshape(N, C, S)        # free reshape, no transpose
    x2f = x2.reshape(N, C, S)

    # --- tile selection: target per-step HBM bytes, fit VMEM, feed both cores ---
    capacity = _vmem_capacity_bytes()
    vmem_limit = int(capacity * 0.7)           # raise the scoped limit explicitly
    budget = capacity // 2                      # headroom for compiler scratch etc.
    target_step_bytes = 4 << 20                 # ~4 MiB HBM traffic per grid step

    w_bytes = 2 * C * C * e                     # single-buffered resident weights
    usable = max(1, budget - w_bytes)

    # Lane tile: full spatial extent if its double-buffered blocks fit, else the
    # largest 128-multiple that fits at NB=1 (tail block handled by cdiv masking).
    if 8 * C * S * e <= usable:
        ts = S
    else:
        ts = (usable // (8 * C * e)) // 128 * 128
        ts = max(128, min(ts, S))

    # Image batch per step: enough to reach the byte target, bounded by VMEM and a
    # small cap on the static unroll.
    step_traffic_per_image = 4 * C * ts * e               # in (x1+x2) + out
    nb_vmem = max(1, usable // (8 * C * ts * e))
    nb_target = max(1, -(-target_step_bytes // step_traffic_per_image))
    NB = max(1, min(N, nb_vmem, nb_target, 16))
    while N % NB:                                          # keep every block full
        NB -= 1

    # Megacore: make sure there are >= 2 grid steps when the problem allows it.
    steps = (N // NB) * pl.cdiv(S, ts)
    if steps < 2:
        if N >= 2:
            NB = max(1, N // 2)
            while N % NB:
                NB -= 1
        elif S >= 256 and S % 256 == 0:
            ts = S // 2

    grid = (N // NB, pl.cdiv(S, ts))

    cost = pl.CostEstimate(
        flops=4 * N * C * C * S,                               # two 1x1 convs
        transcendentals=0,
        bytes_accessed=(2 * N * C * S + 2 * N * C * S + 2 * C * C) * e,
    )

    out = pl.pallas_call(
        _reduce_branch_kernel,
        out_shape=jax.ShapeDtypeStruct((N, 2, C, S), x.dtype),
        grid_spec=pltpu.PrefetchScalarGridSpec(
            num_scalar_prefetch=0,
            grid=grid,
            in_specs=[
                pl.BlockSpec((NB, C, ts), lambda b, s: (b, 0, s)),
                pl.BlockSpec((NB, C, ts), lambda b, s: (b, 0, s)),
                # Grid-invariant block index + single buffer: weights are fetched
                # once and stay resident in VMEM across the whole grid.
                pl.BlockSpec((C, C), lambda b, s: (0, 0),
                             pipeline_mode=pl.Buffered(1)),
                pl.BlockSpec((C, C), lambda b, s: (0, 0),
                             pipeline_mode=pl.Buffered(1)),
            ],
            out_specs=pl.BlockSpec((NB, 2, C, ts), lambda b, s: (b, 0, 0, s)),
        ),
        compiler_params=pltpu.CompilerParams(
            dimension_semantics=("parallel", "parallel"),
            vmem_limit_bytes=vmem_limit,
        ),
        cost_estimate=cost,
    )(x1f, x2f, w1, w2)

    # (N, 2, C, S) -> (N, 2C, Ho, Wo): exactly torch.cat([out1, out2], dim=1) order,
    # and a pure (free) reshape — no transpose.
    return out.reshape(N, 2 * C, Ho, Wo)


def reduce_branch_ref(x, w1, w2, stride=2):
    """Pure-JAX reference (mirrors the PyTorch forward)."""
    x1 = x[:, :, ::stride, ::stride]
    shift = jnp.pad(x[:, :, 1:, 1:], ((0, 0), (0, 0), (0, 1), (0, 1)))
    x2 = shift[:, :, ::stride, ::stride]
    out1 = jnp.einsum("oc,nchw->nohw", w1, x1)
    out2 = jnp.einsum("oc,nchw->nohw", w2, x2)
    return jnp.concatenate([out1, out2], axis=1)


if __name__ == "__main__":
    key = jax.random.PRNGKey(0)
    k_x, k_w1, k_w2 = jax.random.split(key, 3)

    N, C, H, W = 2, 4, 16, 16
    x = jax.random.normal(k_x, (N, C, H, W), dtype=jnp.float32)
    # Conv2d(planes, planes, 1, bias=False) weights, squeezed to (Cout, Cin)
    w1 = jax.random.normal(k_w1, (C, C), dtype=jnp.float32) * (1.0 / C) ** 0.5
    w2 = jax.random.normal(k_w2, (C, C), dtype=jnp.float32) * (1.0 / C) ** 0.5

    out = jax.block_until_ready(reduce_branch_pallas(x, w1, w2))
    ref = jax.block_until_ready(reduce_branch_ref(x, w1, w2))

    assert out.shape == (N, 2 * C, H // 2, W // 2), out.shape
    assert jnp.allclose(out, ref, atol=1e-5, rtol=1e-5), "mismatch vs reference"
    print("KERNEL_OK")
</pallas_src>

<mosaic_0001>
module attributes {stable_mosaic.version = 11 : i64} {
  func.func @_reduce_branch_kernel(%arg0: i32, %arg1: i32, %arg2: memref<1x4x64xf32, #tpu.memory_space<vmem>>, %arg3: memref<1x4x64xf32, #tpu.memory_space<vmem>>, %arg4: memref<4x4xf32, #tpu.memory_space<vmem>>, %arg5: memref<4x4xf32, #tpu.memory_space<vmem>>, %arg6: memref<1x2x4x64xf32, #tpu.memory_space<vmem>>) attributes {dimension_semantics = [#tpu.dimension_semantics<parallel>, #tpu.dimension_semantics<parallel>], iteration_bounds = array<i64: 2, 1>, scalar_prefetch = 0 : i64, scratch_operands = 0 : i64, tpu.core_type = #tpu.core_type<tc>, window_params = [{transform_indices = @transform_0, window_bounds = array<i64: 1, 4, 64>}, {transform_indices = @transform_1, window_bounds = array<i64: 1, 4, 64>}, {pipeline_mode = #tpu.pipeline_mode<synchronous>, transform_indices = @transform_2, window_bounds = array<i64: 4, 4>}, {pipeline_mode = #tpu.pipeline_mode<synchronous>, transform_indices = @transform_3, window_bounds = array<i64: 4, 4>}, {transform_indices = @transform_4, window_bounds = array<i64: 1, 2, 4, 64>}]} {
    %c0 = arith.constant 0 : index
    %c0_0 = arith.constant 0 : index
    %0 = vector.load %arg4[%c0, %c0_0] : memref<4x4xf32, #tpu.memory_space<vmem>>, vector<4x4xf32>
    %c0_1 = arith.constant 0 : index
    %c0_2 = arith.constant 0 : index
    %1 = vector.load %arg5[%c0_1, %c0_2] : memref<4x4xf32, #tpu.memory_space<vmem>>, vector<4x4xf32>
    %c0_3 = arith.constant 0 : index
    %c0_4 = arith.constant 0 : index
    %c0_5 = arith.constant 0 : index
    %2 = vector.load %arg2[%c0_3, %c0_4, %c0_5] : memref<1x4x64xf32, #tpu.memory_space<vmem>>, vector<1x4x64xf32>
    %3 = vector.shape_cast %2 : vector<1x4x64xf32> to vector<4x64xf32>
    %cst = arith.constant dense<0.000000e+00> : vector<4x64xf32>
    %4 = tpu.matmul %0, %3, %cst {dimension_numbers = #tpu.dot_dimension_numbers<[1], [0], [0], [1], [0, 0, 1, 1], [], []>} : vector<4x4xf32>, vector<4x64xf32>, vector<4x64xf32> -> vector<4x64xf32>
    %c0_6 = arith.constant 0 : index
    %c0_7 = arith.constant 0 : index
    %c0_8 = arith.constant 0 : index
    %c0_9 = arith.constant 0 : index
    %5 = vector.load %arg6[%c0_6, %c0_7, %c0_8, %c0_9] : memref<1x2x4x64xf32, #tpu.memory_space<vmem>>, vector<1x1x4x64xf32>
    %6 = vector.shape_cast %5 : vector<1x1x4x64xf32> to vector<4x64xf32>
    %7 = vector.shape_cast %4 : vector<4x64xf32> to vector<1x1x4x64xf32>
    tpu.vector_store %arg6[%c0_6, %c0_7, %c0_8, %c0_9], %7 {strides = array<i32>} : memref<1x2x4x64xf32, #tpu.memory_space<vmem>>, vector<1x1x4x64xf32>,
    %c0_10 = arith.constant 0 : index
    %c0_11 = arith.constant 0 : index
    %c0_12 = arith.constant 0 : index
    %8 = vector.load %arg3[%c0_10, %c0_11, %c0_12] : memref<1x4x64xf32, #tpu.memory_space<vmem>>, vector<1x4x64xf32>
    %9 = vector.shape_cast %8 : vector<1x4x64xf32> to vector<4x64xf32>
    %cst_13 = arith.constant dense<0.000000e+00> : vector<4x64xf32>
    %10 = tpu.matmul %1, %9, %cst_13 {dimension_numbers = #tpu.dot_dimension_numbers<[1], [0], [0], [1], [0, 0, 1, 1], [], []>} : vector<4x4xf32>, vector<4x64xf32>, vector<4x64xf32> -> vector<4x64xf32>
    %c0_14 = arith.constant 0 : index
    %c1 = arith.constant 1 : index
    %c0_15 = arith.constant 0 : index
    %c0_16 = arith.constant 0 : index
    %11 = vector.load %arg6[%c0_14, %c1, %c0_15, %c0_16] : memref<1x2x4x64xf32, #tpu.memory_space<vmem>>, vector<1x1x4x64xf32>
    %12 = vector.shape_cast %11 : vector<1x1x4x64xf32> to vector<4x64xf32>
    %13 = vector.shape_cast %10 : vector<4x64xf32> to vector<1x1x4x64xf32>
    tpu.vector_store %arg6[%c0_14, %c1, %c0_15, %c0_16], %13 {strides = array<i32>} : memref<1x2x4x64xf32, #tpu.memory_space<vmem>>, vector<1x1x4x64xf32>,
    return
  }
  func.func @transform_0(%arg0: i32, %arg1: i32) -> (i32, i32, i32) {
    %c0_i32 = arith.constant 0 : i32
    %c0_i32_0 = arith.constant 0 : i32
    return %arg0, %c0_i32, %arg1 : i32, i32, i32
  }
  func.func @transform_1(%arg0: i32, %arg1: i32) -> (i32, i32, i32) {
    %c0_i32 = arith.constant 0 : i32
    %c0_i32_0 = arith.constant 0 : i32
    return %arg0, %c0_i32, %arg1 : i32, i32, i32
  }
  func.func @transform_2(%arg0: i32, %arg1: i32) -> (i32, i32) {
    %c0_i32 = arith.constant 0 : i32
    %c0_i32_0 = arith.constant 0 : i32
    %c0_i32_1 = arith.constant 0 : i32
    return %c0_i32, %c0_i32_0 : i32, i32
  }
  func.func @transform_3(%arg0: i32, %arg1: i32) -> (i32, i32) {
    %c0_i32 = arith.constant 0 : i32
    %c0_i32_0 = arith.constant 0 : i32
    %c0_i32_1 = arith.constant 0 : i32
    return %c0_i32, %c0_i32_0 : i32, i32
  }
  func.func @transform_4(%arg0: i32, %arg1: i32) -> (i32, i32, i32, i32) {
    %c0_i32 = arith.constant 0 : i32
    %c0_i32_0 = arith.constant 0 : i32
    %c0_i32_1 = arith.constant 0 : i32
    return %arg0, %c0_i32, %c0_i32_0, %arg1 : i32, i32, i32, i32
  }
}

</mosaic_0001>

<bundles_post_ra>
// kernel: tpu_custom_call.1
= control target key start
LH: loop header
LB: loop body
LE: loop exit
PB: predicated region body
PF: predicated region fallthrough
CT: control target
= control target key end

     0   :  { %s1035_s0 = inlined_call_operand.hbm [shape: f32[2,4,64], index: 0, kind: input, shape index: {}]   ;;  %s1036_s1 = inlined_call_operand.hbm [shape: f32[2,4,64], index: 1, kind: input, shape index: {}]   ;;  %s1037_s2 = inlined_call_operand.hbm [shape: f32[4,4], index: 2, kind: input, shape index: {}]   ;;  %s1038_s3 = inlined_call_operand.hbm [shape: f32[4,4], index: 3, kind: input, shape index: {}]   ;;  %s1039_s4 = inlined_call_operand.hbm [shape: f32[2,2,4,64], index: 4, kind: output, shape index: {}]  }
   0x1   :  { %1042 = sst [smem:[#allocation19_spill]] %s1037_s2 }
   0x2   :  { %1043 = sst [smem:[#allocation20_spill]] %s1038_s3 }
   0x3   :  { %9 = vsyncpa [#allocation3], 0 }
   0x4   :  { %11 = vsyncpa [#allocation3 + $0x1], 0 }
   0x5   :  { %12 = vsyncpa [#allocation6], 0 }
   0x6   :  { %14 = vsyncpa [#allocation6 + $0x1], 0 }
   0x7   :  { %15 = vsyncpa [#allocation9], 0 }
   0x8   :  { %16 = vsyncpa [#allocation4], 0 }
   0x9   :  { %18 = vsyncpa [#allocation4 + $0x1], 0  ;;  %s871_s15 = smov 0   ;;  %s873_s16 = smov 0  }
   0xa   :  { %s875_s17 = smov 0   ;;  %s877_s18 = smov 0  }
   0xb   :  { %s879_s19 = smov 0   ;;  %s881_s20 = smov 0  }
   0xc LB: > { %1044 = sst [smem:[#allocation16_spill]] %s836_s19  ;;  %s902_s21 = sadd.s32 4294967295, %s840_s20   ;;  %s840_s20 = sphi %s881_s20, %s24_s20   ;;  %s836_s19 = sphi %s879_s19, %s1060_s19   ;;  %s832_s18 = sphi %s877_s18, %s1055_s18   ;;  %s828_s17 = sphi %s875_s17, %s1059_s17   ;;  %s824_s16 = sphi %s873_s16, %s1058_s16   ;;  %s820_s15 = sphi %s871_s15, %s1057_s15  }
   0xd   : > { %s510_s22 = sadd.s32 4294967294, %s840_s20   ;;  %p58_p0 = scmp.ne.s32.totalorder %s824_s16, %s820_s15 }
   0xe   : > { %p59_p1 = scmp.eq.s32.totalorder %s902_s21, 0  ;;  %p154_p2 = scmp.eq.s32.totalorder %s902_s21, 1 }
   0xf   : > { %p160_p3 = scmp.eq.s32.totalorder %s510_s22, 1  ;;  %p511_p5 = scmp.ge.s32.totalorder %s840_s20, 1 }
  0x10   : > { %p911_p4 = por %p59_p1, %p58_p0  ;;  %p167_p7 = scmp.lt.s32.totalorder %s840_s20, 3 }
  0x11   : > { %p916_p6 = por %p160_p3, %p58_p0  ;;  %s1047_s2 = sld [smem:[#allocation19_spill]] }
  0x12   : > { %p924_p8 = pnand %p511_p5, %p167_p7  ;;  %p514_p9 = scmp.ge.s32.totalorder %s840_s20, 2 }
  0x13   : > { %s842_s29 = smov [#allocation7]   ;;  %s1049_s3 = sld [smem:[#allocation20_spill]] }
  0x14   : > { %p550_p10 = pneg %p924_p8  ;;  %s181_s30 = sshll.u32 %s842_s29, 4  ;;  %s182_s30 = int_to_ptr.vmem [resolvable:$true] %s181_s30 }
  0x15   : > { %s843_s8 = smov [#allocation8]   ;;  %s36_s10 = sadd.s32 1, %s836_s19 }
  0x16   : > { %p551_p11 = pnand %p550_p10, %p59_p1  ;;  %s193_s9 = sshll.u32 %s843_s8, 4  ;;  %s194_s9 = int_to_ptr.vmem [resolvable:$true] %s193_s9 }
  0x17   : > { %s179_s27 = sshll.u32 %s1047_s2, 4  ;;  %s45_s11 = sadd.s32 1, %s828_s17  ;;  %s180_s27 = int_to_ptr.hbm [resolvable:$true] %s179_s27 }
  0x18   : > { %553 = dma.hbm_to_vmem [thread:$0]  (!%p551_p11), %s180_s27, 64, %s182_s30, [#allocation6]  }
  0x19   : > { %s191_s7 = sshll.u32 %s1049_s3, 4  ;;  %p38_p12 = scmp.ge.s32.totalorder %s36_s10, 2  ;;  %s192_s7 = int_to_ptr.hbm [resolvable:$true] %s191_s7 }
  0x1a   : > { %556 = dma.hbm_to_vmem [thread:$0]  (!%p551_p11), %s192_s7, 64, %s194_s9, [#allocation9]  }
  0x1b   : > { %p52_p13 = scmp.ne.s32.totalorder %s828_s17, %s824_s16  ;;  %p53_p0 = scmp.eq.s32.totalorder %s840_s20, 0 }
  0x1c   : > { %p570_p3 = scmp.lt.s32.totalorder %s840_s20, 2  ;;  %s1062_s10 = smov (%p38_p12, %s36_s10), 0 }
  0x1d   : > { %1050 = sst [smem:[#allocation17_spill]] %s1062_s10  ;;  %p944_p5 = por %p53_p0, %p52_p13 }
  0x1e   : > { %p950_p7 = por %p154_p2, %p52_p13  ;;  %s40_s14 = ssub.s32 %s836_s19, %s1062_s10 }
  0x1f   : > { %s204_s22 = sand.u32 1, %s828_s17   ;;  %p43_p10 = scmp.eq.s32.totalorder %s40_s14, 0 }
  0x20   : > { %s515_s25 = sshll.u32 %s204_s22, 2  ;;  %s516_s26 = sshll.u32 %s836_s19, 2 }
  0x21   : > { %s959_s27 = scalar_select %p43_p10, %s828_s17, %s45_s11  }
  0x22   : > { %s213_s5 = scalar_lea.hbm %s1035_s0, %s516_s26  ;;  %s208_s7 = scalar_lea.vmem [#allocation2], %s515_s25 }
  0x23   : > { %1053 = sst [smem:[#allocation18_spill]] %s959_s27  ;;  %s215_s6 = sshll.u32 %s213_s5, 4  ;;  %s216_s6 = int_to_ptr.hbm [resolvable:$true] %s215_s6 }
  0x24   : > { %s217_s8 = sshll.u32 %s208_s7, 4  ;;  %p558_p2 = pnand %p570_p3, %p944_p5  ;;  %s218_s8 = int_to_ptr.vmem [resolvable:$true] %s217_s8 }
  0x25   : > { %s233_s14 = scalar_lea.hbm %s1036_s1, %s516_s26  ;;  %s224_s3 = sand.u32 1, %s840_s20  }
  0x26   : > { %s205_s10 = scalar_lea.sflag [#allocation3], %s204_s22  ;;  %s235_s11 = sshll.u32 %s233_s14, 4  ;;  %s236_s11 = int_to_ptr.hbm [resolvable:$true] %s235_s11 }
  0x27   : > { %560 = dma.hbm_to_vmem [thread:$0]  (!%p558_p2), %s216_s6, 64, %s218_s8, %s205_s10  }
  0x28   : > { %s228_s19 = scalar_lea.vmem [#allocation5], %s515_s25  ;;  %s225_s29 = scalar_lea.sflag [#allocation6], %s224_s3 }
  0x29   : > { %s237_s27 = sshll.u32 %s228_s19, 4  ;;  %246 = sbr.rel (%p924_p8) target bundleno = 187 (0xbb), region = 36  ;;  %s238_s27 = int_to_ptr.vmem [resolvable:$true] %s237_s27 }
  0x2a   : > { %563 = dma.hbm_to_vmem [thread:$0]  (!%p558_p2), %s236_s11, 64, %s238_s27, %s225_s29  }
  0x2b   : > { %s975_s12 = sand.u32 (!%p924_p8), 1, %s824_s16  }
  0x2c   : > { %s520_s2 = sshll.u32 (!%p924_p8), %s975_s12, 2  ;;  %s249_s26 = scalar_lea.sflag (!%p924_p8), [#allocation3], %s975_s12 }
  0x2d   : > { %s252_s22 = scalar_lea.vmem (!%p924_p8), [#allocation2], %s520_s2 }
  0x2e   : > { %799 = dma.done.wait (%p911_p4), %s249_s26, 64  }
  0x2f   : > { %801 = vsyncadd (%p911_p4), %s249_s26, 4294967232  ;;  %s258_s3 = sand.u32 1, %s902_s21   ;;  %s262_s28 = scalar_lea.vmem [#allocation5], %s520_s2 }
  0x30   : > { %s259_s19 = scalar_lea.sflag [#allocation6], %s258_s3 }
  0x31   : > { %803 = dma.done.wait (%p911_p4), %s259_s19, 64  }
  0x32   : > { %805 = vsyncadd (%p911_p4), %s259_s19, 4294967232 }
  0x33   : > { %807 = dma.done.wait (%p59_p1), [#allocation6], 64  }
  0x34   : > { %809 = vsyncadd (%p59_p1), [#allocation6], 4294967232 }
  0x35   : > { %811 = dma.done.wait (%p59_p1), [#allocation9], 64  }
  0x36   : > { %813 = vsyncadd (%p59_p1), [#allocation9], 4294967232  ;;  %vm310_vm0 = vcmask 1043456   ;;  %vm306_vm1 = vcmask 31744   ;;  %v305_v0 = vld [vmem:[%s252_s22] sm:$0xf] }
  0x37   : > { %v336_v1 = vld [vmem:[%s262_s28] sm:$0xf]  ;;  %v303_v2 = vld [vmem:[#allocation7] sm:$0xf]  ;;  %525 = vmatpush.msk.msra.mxu0 %vm310_vm0, %v305_v0  ;;  %v304_v3 = vld [vmem:[#allocation8] sm:$0xf] }
  0x38   : > { %527 = vmatpush.msk.msra.mxu1 %vm310_vm0, %v336_v1  ;;  %526 = vmatmul.msk.f32.vlgmr.msra.gmra.mxu0 %vm306_vm1, %v303_v2  ;;  %s524_s23 = sshll.u32 %s975_s12, 3  ;;  %s535_s10 = sshll.u32 %s832_s18, 3  ;;  %vm334_vm2 = vcmask 519168  }
  0x39   : > { %528 = vmatmul.msk.f32.vlgmr.msra.gmra.mxu1 %vm306_vm1, %v304_v3  ;;  %s378_s21 = scalar_lea.hbm %s1039_s4, %s535_s10  ;;  %s302_s30 = scalar_lea.vmem [#allocation10], %s524_s23 }
  0x3a   : > { %s379_s5 = sshll.u32 %s302_s30, 4  ;;  %s381_s6 = sshll.u32 %s378_s21, 4  ;;  %s380_s5 = int_to_ptr.vmem [resolvable:$true] %s379_s5  ;;  %s382_s6 = int_to_ptr.hbm [resolvable:$true] %s381_s6 }
  0x3b   : > { %s366_s7 = scalar_lea.sflag [#allocation4], %s975_s12  ;;  %s760_s8 = sshra.s32 %s382_s6, 4  ;;  %s761_s8 = int_to_ptr.hbm [resolvable:$true] %s760_s8 }
  0x3c   : > { %s762_s9 = scalar_lea.hbm %s761_s8, 8  ;;  %s766_s11 = scalar_lea.hbm %s1039_s4, 16 }
  0x3d   : > { %p763_p1 = scmp.ne.s32.totalorder %s761_s8, %s762_s9  ;;  %p767_p11 = scmp.lt.s32.totalorder %s761_s8, %s1039_s4 }
  0x3e   : > { %p768_p12 = scmp.lt.s32.totalorder %s766_s11, %s762_s9 }
  0x3f   : > { %p764_p4 = pnand %p763_p1, %p950_p7 }
  0x40   : > { %p769_p13 = por %p768_p12, %p767_p11 }
  0x41   : > { %p765_p8 = pneg %p764_p4 }
  0x43   : > { %p770_p0 = pnand %p769_p13, %p765_p8 }
  0xb5   : > { %v331_v4 = vpop.f32.mrf.mxu0 }
  0xb6   : > { %v360_v5 = vpop.f32.mrf.mxu1  ;;  %335 = vst.msk [vmem:[%s302_s30] sm:$0xf] %vm334_vm2, %v331_v4 }
  0xb7   : > { %529 = vst.msk [vmem:[%s302_s30 + $0x4] sm:$0xf] %vm334_vm2, %v360_v5 }
  0xb8   : > { %773 = shalt.err (!%p770_p0)
}
  0xb9   : > { %s844_s12 = smov 64   ;;  %s845_s26 = smov 4  }
  0xba   : > { %548 = dma.vmem_to_hbm [thread:$0]  (%p950_p7), %s380_s5, 128, %s382_s6, %s366_s7, %s844_s12, %s844_s12, %s845_s26  }
  0xbb PF: > { %s396_s22 = sand.u32 1, %s820_s15   ;;  %p565_p3 = pnand %p514_p9, %p916_p6 }
  0xbc   : > { %s397_s3 = scalar_lea.sflag [#allocation4], %s396_s22 }
  0xbd   : > { %p566_p5 = pneg %p565_p3 }
  0xbf   : > { %815 = dma.done.wait (%p566_p5), %s397_s3, 128  }
  0xc0   : > { %817 = vsyncadd (%p566_p5), %s397_s3, 4294967168  ;;  %s24_s20 = sadd.s32 1, %s840_s20   ;;  %s1054_s19 = sld [smem:[#allocation18_spill]] }
  0xc1   : > { %p21_p10 = scmp.ge.s32.totalorder %s24_s20, 4   ;;  %s1055_s18 = sld [smem:[#allocation16_spill]] }
  0xc2   : > { %s1056_s13 = sld [smem:[#allocation17_spill]]  ;;  %s1057_s15 = smov %s824_s16 }
  0xc3   : > { %s1058_s16 = smov %s828_s17 }
  0xc4   :  { %23 = sbr.rel (!%p21_p10) target bundleno = 12 (0xc), region = 103 }
  0xc6   : > { %s1059_s17 = smov %s1054_s19 }
  0xc8   : > { %s1060_s19 = smov %s1056_s13 }
  0xc9   :  { %403 = vsyncpa [#allocation3], 1 }
  0xca   :  { %405 = vsyncpa [#allocation3 + $0x1], 1 }
  0xcb   :  { %406 = vsyncpa [#allocation6], 1 }
  0xcc   :  { %408 = vsyncpa [#allocation6 + $0x1], 1 }
  0xcd   :  { %409 = vsyncpa [#allocation9], 1 }
  0xce   :  { %410 = vsyncpa [#allocation4], 1 }
  0xcf   :  { %412 = vsyncpa [#allocation4 + $0x1], 1 }

</bundles_post_ra>
